<compile_context>
chip_gen: v7x
topology: tpu7x:2x2x1
jax: 0.10.0
libtpu: 0.0.40
codegen_flags: <defaults>
</compile_context>

<pallas_src>
import functools

import jax
import jax.numpy as jnp
from jax.experimental import pallas as pl
from jax.experimental.pallas import tpu as pltpu


# Cap on the static per-block batch unroll inside the kernel body.
_MAX_TB_UNROLL = 16


def _vmem_budgets():
    """Generation-aware (pipelined-footprint budget, vmem_limit_bytes)."""
    cap = None
    try:
        cap = pltpu.get_tpu_info().vmem_capacity_bytes
    except Exception:  # query unavailable (e.g. interpret mode)
        cap = None
    if cap is None:
        cap = 64 * 1024 * 1024  # assume the smallest generation (v7x)
    if cap >= 96 * 1024 * 1024:
        # v5e / v6e: 128 MiB physical VMEM per TC.  Big contiguous blocks.
        return 32 * 1024 * 1024, 64 * 1024 * 1024
    # v7x: 64 MiB physical VMEM per TC.  Keep ~24 MiB pipelined footprint and
    # leave Mosaic scratch headroom below the 48 MiB limit.
    return 24 * 1024 * 1024, 48 * 1024 * 1024


def _choose_tiles(B, C, H, W, itemsize, budget_bytes):
    """Pick (TB, tw) so 4 * TB*C*H*tw*itemsize (in + out, double-buffered)
    stays under `budget_bytes`.  Returns None when even a minimal block does
    not fit (caller falls back to XLA)."""
    max_block_bytes = budget_bytes // 4          # in + out, double-buffered
    plane_bytes = C * H * itemsize               # bytes per element per lane

    # --- Lane tile ---------------------------------------------------------
    if plane_bytes * W <= max_block_bytes:
        tw = W                                   # full, contiguous lane dim
    elif W >= 128:
        if plane_bytes * 128 > max_block_bytes:
            return None                          # C*H too large even for 128 lanes
        lanes = (max_block_bytes // plane_bytes) // 128 * 128
        if W % 128 == 0:
            tw = min(W, lanes)
            while tw > 128 and W % tw != 0:      # keep every store unmasked
                tw -= 128
        else:
            # Large ragged W: lane-dense tiles + one masked edge block (cdiv).
            tw = max(128, min(lanes, (W // 128) * 128))
    else:
        return None                              # W < 128 and slab too big

    # --- Batch tile ---------------------------------------------------------
    tb = min(B, _MAX_TB_UNROLL, max(1, max_block_bytes // (plane_bytes * tw)))
    while tb > 1 and B % tb != 0:                # prefer no ragged leading block
        tb -= 1
    return tb, tw


def _relayout_chw_to_hcw(x):
    """(C, H, W) -> (H, C, W); lane axis W untouched (sublane relayout only)."""
    if hasattr(pltpu, "einshape"):
        return pltpu.einshape("chw->hcw", x)
    return jnp.transpose(x, (1, 0, 2))


def _permute_0213_kernel(x_ref, o_ref, *, tb):
    # x_ref: (TB, C, H, TW); o_ref: (TB, H, C, TW).
    # Static unrolled loop: TB cheap sublane relayouts, one big DMA per block.
    for b in range(tb):
        o_ref[b] = _relayout_chw_to_hcw(x_ref[b])


def _permute_0213_pallas(x):
    B, C, H, W = x.shape
    itemsize = jnp.dtype(x.dtype).itemsize
    budget, vmem_limit = _vmem_budgets()

    tiles = _choose_tiles(B, C, H, W, itemsize, budget)
    if tiles is None:
        # TODO(synk): also tile C/H for pathologically large planes instead of
        # falling back to XLA.
        return jnp.transpose(x, (0, 2, 1, 3))
    tb, tw = tiles
    grid = (pl.cdiv(B, tb), pl.cdiv(W, tw))

    return pl.pallas_call(
        functools.partial(_permute_0213_kernel, tb=tb),
        out_shape=jax.ShapeDtypeStruct((B, H, C, W), x.dtype),
        grid_spec=pltpu.PrefetchScalarGridSpec(
            num_scalar_prefetch=0,
            grid=grid,
            in_specs=[pl.BlockSpec((tb, C, H, tw), lambda b, w: (b, 0, 0, w))],
            out_specs=pl.BlockSpec((tb, H, C, tw), lambda b, w: (b, 0, 0, w)),
        ),
        compiler_params=pltpu.CompilerParams(
            dimension_semantics=("parallel", "parallel"),
            vmem_limit_bytes=vmem_limit,
        ),
        cost_estimate=pl.CostEstimate(
            flops=0,
            transcendentals=0,
            bytes_accessed=2 * B * C * H * W * itemsize,
        ),
    )(x)


def permute2d(x, shape):
    """Pallas-backed equivalent of torch.permute(x, shape)."""
    perm = tuple(shape)
    assert len(perm) == x.ndim, (perm, x.shape)

    if perm == tuple(range(x.ndim)):
        return x
    if x.ndim == 4 and perm == (0, 2, 1, 3):
        # CLEEGN's permutation: batch fixed, lane axis preserved -> fast path.
        return _permute_0213_pallas(x)

    # TODO(synk): permutations that move the batch axis or move W off the
    # minor (lane) axis need a true lane-transpose kernel; fall back to XLA.
    return jnp.transpose(x, perm)


class Permute2d:
    """Mirror of the PyTorch module; holds the permutation, applies the kernel."""

    def __init__(self, shape):
        self.shape = tuple(shape)

    def __call__(self, x):
        return permute2d(x, self.shape)


if __name__ == "__main__":
    key = jax.random.PRNGKey(0)
    perm = (0, 2, 1, 3)  # CLEEGN uses Permute2d((0, 2, 1, 3))
    module = Permute2d(perm)

    # Small, narrow-lane case (W < 128) — matches the original module's use.
    B, C, H, W = 2, 4, 16, 16
    x = jax.random.normal(key, (B, C, H, W), dtype=jnp.float32)
    out = jax.block_until_ready(module(x))
    ref = jnp.transpose(x, perm)
    assert out.shape == ref.shape, (out.shape, ref.shape)
    assert out.dtype == ref.dtype
    assert jnp.array_equal(out, ref), "narrow-lane permute mismatch"

    # Lane-dense case (W a multiple of 128) exercising unmasked stores and
    # batched (TB > 1) blocks.
    x2 = jax.random.normal(jax.random.PRNGKey(0), (2, 4, 16, 256), dtype=jnp.float32)
    out2 = jax.block_until_ready(module(x2))
    assert jnp.array_equal(out2, jnp.transpose(x2, perm)), "lane-dense permute mismatch"

    # Ragged lane dim (full-W block, still legal since block == full dim).
    x3 = jax.random.normal(jax.random.PRNGKey(1), (3, 4, 16, 200), dtype=jnp.float32)
    out3 = jax.block_until_ready(module(x3))
    assert jnp.array_equal(out3, jnp.transpose(x3, perm)), "ragged-lane permute mismatch"

    # Non-fast-path perm falls back to XLA transpose (same semantics).
    out4 = jax.block_until_ready(Permute2d((0, 3, 1, 2))(x))
    assert jnp.array_equal(out4, jnp.transpose(x, (0, 3, 1, 2)))

    print("KERNEL_OK")
</pallas_src>

<mosaic_0001>
module attributes {stable_mosaic.version = 11 : i64} {
  func.func @_permute_0213_kernel(%arg0: i32, %arg1: i32, %arg2: memref<2x4x16x16xf32, #tpu.memory_space<vmem>>, %arg3: memref<2x16x4x16xf32, #tpu.memory_space<vmem>>) attributes {dimension_semantics = [#tpu.dimension_semantics<parallel>, #tpu.dimension_semantics<parallel>], iteration_bounds = array<i64: 1, 1>, scalar_prefetch = 0 : i64, scratch_operands = 0 : i64, tpu.core_type = #tpu.core_type<tc>, window_params = [{transform_indices = @transform_0, window_bounds = array<i64: 2, 4, 16, 16>}, {transform_indices = @transform_1, window_bounds = array<i64: 2, 16, 4, 16>}]} {
    %c0 = arith.constant 0 : index
    %c0_0 = arith.constant 0 : index
    %c0_1 = arith.constant 0 : index
    %c0_2 = arith.constant 0 : index
    %0 = vector.load %arg2[%c0, %c0_0, %c0_1, %c0_2] : memref<2x4x16x16xf32, #tpu.memory_space<vmem>>, vector<1x4x16x16xf32>
    %1 = vector.shape_cast %0 : vector<1x4x16x16xf32> to vector<4x16x16xf32>
    %2 = tpu.transpose %1, [1, 0, 2] : vector<4x16x16xf32> -> vector<16x4x16xf32>
    %c0_3 = arith.constant 0 : index
    %c0_4 = arith.constant 0 : index
    %c0_5 = arith.constant 0 : index
    %c0_6 = arith.constant 0 : index
    %3 = vector.load %arg3[%c0_3, %c0_4, %c0_5, %c0_6] : memref<2x16x4x16xf32, #tpu.memory_space<vmem>>, vector<1x16x4x16xf32>
    %4 = vector.shape_cast %3 : vector<1x16x4x16xf32> to vector<16x4x16xf32>
    %5 = vector.shape_cast %2 : vector<16x4x16xf32> to vector<1x16x4x16xf32>
    tpu.vector_store %arg3[%c0_3, %c0_4, %c0_5, %c0_6], %5 {strides = array<i32>} : memref<2x16x4x16xf32, #tpu.memory_space<vmem>>, vector<1x16x4x16xf32>,
    %c1 = arith.constant 1 : index
    %c0_7 = arith.constant 0 : index
    %c0_8 = arith.constant 0 : index
    %c0_9 = arith.constant 0 : index
    %6 = vector.load %arg2[%c1, %c0_7, %c0_8, %c0_9] : memref<2x4x16x16xf32, #tpu.memory_space<vmem>>, vector<1x4x16x16xf32>
    %7 = vector.shape_cast %6 : vector<1x4x16x16xf32> to vector<4x16x16xf32>
    %8 = tpu.transpose %7, [1, 0, 2] : vector<4x16x16xf32> -> vector<16x4x16xf32>
    %c1_10 = arith.constant 1 : index
    %c0_11 = arith.constant 0 : index
    %c0_12 = arith.constant 0 : index
    %c0_13 = arith.constant 0 : index
    %9 = vector.load %arg3[%c1_10, %c0_11, %c0_12, %c0_13] : memref<2x16x4x16xf32, #tpu.memory_space<vmem>>, vector<1x16x4x16xf32>
    %10 = vector.shape_cast %9 : vector<1x16x4x16xf32> to vector<16x4x16xf32>
    %11 = vector.shape_cast %8 : vector<16x4x16xf32> to vector<1x16x4x16xf32>
    tpu.vector_store %arg3[%c1_10, %c0_11, %c0_12, %c0_13], %11 {strides = array<i32>} : memref<2x16x4x16xf32, #tpu.memory_space<vmem>>, vector<1x16x4x16xf32>,
    return
  }
  func.func @transform_0(%arg0: i32, %arg1: i32) -> (i32, i32, i32, i32) {
    %c0_i32 = arith.constant 0 : i32
    %c0_i32_0 = arith.constant 0 : i32
    %c0_i32_1 = arith.constant 0 : i32
    return %arg0, %c0_i32, %c0_i32_0, %arg1 : i32, i32, i32, i32
  }
  func.func @transform_1(%arg0: i32, %arg1: i32) -> (i32, i32, i32, i32) {
    %c0_i32 = arith.constant 0 : i32
    %c0_i32_0 = arith.constant 0 : i32
    %c0_i32_1 = arith.constant 0 : i32
    return %arg0, %c0_i32, %c0_i32_0, %arg1 : i32, i32, i32, i32
  }
}

</mosaic_0001>

<bundles_post_ra>
// kernel: tpu_custom_call.1
= control target key start
LH: loop header
LB: loop body
LE: loop exit
PB: predicated region body
PF: predicated region fallthrough
CT: control target
= control target key end

     0   :  { %6 = vsyncpa [#allocation3], 0  ;;  %s563_s0 = inlined_call_operand.hbm [shape: f32[2,4,16,16], index: 0, kind: input, shape index: {}]   ;;  %s564_s1 = inlined_call_operand.hbm [shape: f32[2,16,4,16], index: 1, kind: output, shape index: {}]  }
   0x1   :  { %7 = vsyncpa [#allocation4], 0  ;;  %s420_s6 = smov [#allocation2]   ;;  %s372_s10 = scalar_lea.hbm %s563_s0, 2048 }
   0x2   :  { %s13_s7 = sshll.u32 %s420_s6, 4  ;;  %p373_p0 = scmp.ne.s32.totalorder %s563_s0, %s372_s10  ;;  %s14_s7 = int_to_ptr.vmem [resolvable:$true] %s13_s7 }
   0x3   :  { %p376_p1 = scmp.lt.u32.totalorder %s372_s10, %s563_s0 }
   0x5   :  { %p378_p2 = pnand %p376_p1, %p373_p0 }
   0x7   :  { %381 = shalt.err (!%p378_p2)
}
   0x8   :  { %s382_s15 = scalar_lea.vmem %s14_s7, 2048  ;;  %p387_p4 = scmp.lt.s32.totalorder %s14_s7, %s14_s7 }
   0x9   :  { %p383_p3 = scmp.ne.s32.totalorder %s14_s7, %s382_s15  ;;  %p388_p5 = scmp.lt.s32.totalorder %s382_s15, %s382_s15 }
   0xb   :  { %p389_p6 = por %p388_p5, %p387_p4 }
   0xd   :  { %p390_p7 = pnand %p389_p6, %p383_p3 }
   0xf   :  { %393 = shalt.err (!%p390_p7)
}
  0x10   :  { %s421_s16 = smov 128   ;;  %s422_s17 = smov 8  }
  0x11   :  { %19 = dma.hbm_to_vmem [thread:$0]  %s563_s0, 2048, %s14_s7, [#allocation3], %s421_s16, %s421_s16, %s422_s17  }
  0x12   :  { %416 = dma.done.wait [#allocation3], 2048  }
  0x13   :  { %417 = vsyncadd [#allocation3], 4294965248  ;;  %v36_v0 = vlaneseq  ;;  %v423_v1 = vmov 1983009808   ;;  %v424_v3 = vmov 1934713408  }
  0x14   :  { %v34_v2 = vunpack.c.l.s4 %v423_v1  ;;  %v66_v4 = vunpack.c.l.s4 %v424_v3  ;;  %v23_v9 = vld [vmem:[#allocation2] sm:$0xff]  ;;  %v25_v10 = vld [vmem:[#allocation2 + $0x10] sm:$0xff]  ;;  %vm167_vm0 = vcmask 125952   ;;  %v24_v15 = vld [vmem:[#allocation2 + $0x8] sm:$0xff]  ;;  %v425_v55 = vmov 0.0   ;;  %s426_s0 = smov [#allocation5]  }
  0x15   :  { %v37_v5 = vshrl.u32 %v36_v0, 7  ;;  %v27_v11 = vld [vmem:[#allocation2 + $0x20] sm:$0xff]  ;;  %v29_v12 = vld [vmem:[#allocation2 + $0x30] sm:$0xff]  ;;  %v26_v16 = vld [vmem:[#allocation2 + $0x18] sm:$0xff]  ;;  %s351_s20 = sshll.u32 %s426_s0, 4  ;;  %s352_s20 = int_to_ptr.vmem [resolvable:$true] %s351_s20 }
  0x16   :  { %v35_v6 = vunpack.c.0.s8 %v34_v2  ;;  %v67_v7 = vunpack.c.0.s8 %v66_v4  ;;  %v31_v13 = vcombine.low %v23_v9, %v27_v11  ;;  %v32_v14 = vcombine.high %v23_v9, %v27_v11  ;;  %v28_v20 = vld [vmem:[#allocation2 + $0x28] sm:$0xff]  ;;  %v30_v21 = vld [vmem:[#allocation2 + $0x38] sm:$0xff]  ;;  %v455_v22 = vld [vmem:[#allocation2 + $0x40] sm:$0xff]  ;;  %s394_s21 = scalar_lea.vmem %s352_s20, 2048  ;;  %p399_p9 = scmp.lt.s32.totalorder %s352_s20, %s352_s20 }
  0x17   :  { %v47_v17 = vcombine.low %v25_v10, %v29_v12  ;;  %v48_v19 = vcombine.high %v25_v10, %v29_v12  ;;  %v99_v25 = vcombine.low %v24_v15, %v28_v20  ;;  %v115_v26 = vcombine.low %v26_v16, %v30_v21  ;;  %v459_v27 = vld [vmem:[#allocation2 + $0x50] sm:$0xff]  ;;  %v461_v28 = vld [vmem:[#allocation2 + $0x60] sm:$0xff]  ;;  %v186_v54 = vld [vmem:[#allocation2 + $0x48] sm:$0xff]  ;;  %p395_p8 = scmp.ne.s32.totalorder %s352_s20, %s394_s21  ;;  %p400_p10 = scmp.lt.s32.totalorder %s394_s21, %s394_s21 }
  0x18   :  { %v451_v8 = vsub.s32 %v35_v6, %v37_v5  ;;  %v453_v18 = vsub.s32 %v67_v7, %v37_v5  ;;  %v463_v29 = vld [vmem:[#allocation2 + $0x70] sm:$0xff]  ;;  %v100_v32 = vcombine.high %v24_v15, %v28_v20  ;;  %v116_v33 = vcombine.high %v26_v16, %v30_v21  ;;  %v188_v60 = vld [vmem:[#allocation2 + $0x58] sm:$0xff]  ;;  %v190_v61 = vld [vmem:[#allocation2 + $0x68] sm:$0xff] }
  0x19   :  { %v193_v36 = vcombine.low %v455_v22, %v461_v28  ;;  %v209_v37 = vcombine.low %v459_v27, %v463_v29  ;;  %v192_v62 = vld [vmem:[#allocation2 + $0x78] sm:$0xff]  ;;  %v194_v5 = vcombine.high %v455_v22, %v461_v28  ;;  %v210_v6 = vcombine.high %v459_v27, %v463_v29  ;;  %p401_p11 = por %p400_p10, %p399_p9 }
  0x1a   :  { %v39_v23 = vrot.slane %v31_v13, %v451_v8  ;;  %v46_v24 = vrot.slane %v32_v14, %v451_v8  ;;  %v55_v30 = vrot.slane %v47_v17, %v451_v8  ;;  %v62_v31 = vrot.slane %v48_v19, %v451_v8 }
  0x1b   :  { %v107_v34 = vrot.slane %v99_v25, %v451_v8  ;;  %v123_v35 = vrot.slane %v115_v26, %v451_v8  ;;  %v114_v44 = vrot.slane %v100_v32, %v451_v8  ;;  %v130_v45 = vrot.slane %v116_v33, %v451_v8  ;;  %p402_p12 = pnand %p401_p11, %p395_p8 }
  0x1c   :  { %v63_v38 = vcombine.low %v39_v23, %v55_v30  ;;  %v64_v39 = vcombine.high %v39_v23, %v55_v30  ;;  %v79_v40 = vcombine.low %v46_v24, %v62_v31  ;;  %v80_v41 = vcombine.high %v46_v24, %v62_v31 }
  0x1d   :  { %v131_v42 = vcombine.low %v107_v34, %v123_v35  ;;  %v132_v43 = vcombine.high %v107_v34, %v123_v35  ;;  %v147_v52 = vcombine.low %v114_v44, %v130_v45  ;;  %v148_v53 = vcombine.high %v114_v44, %v130_v45 }
  0x1e   :  { %v71_v46 = vrot.slane %v63_v38, %v453_v18  ;;  %v78_v47 = vrot.slane %v64_v39, %v453_v18  ;;  %v87_v48 = vrot.slane %v79_v40, %v453_v18  ;;  %v94_v49 = vrot.slane %v80_v41, %v453_v18 }
  0x1f   :  { %v139_v50 = vrot.slane %v131_v42, %v453_v18  ;;  %v146_v51 = vrot.slane %v132_v43, %v453_v18  ;;  %v155_v1 = vrot.slane %v147_v52, %v453_v18  ;;  %v162_v2 = vrot.slane %v148_v53, %v453_v18 }
  0x20   :  { %168 = vst.msk [vmem:[#allocation5] sm:$0xf] %vm167_vm0, %v71_v46  ;;  %v95_v56 = vcombine.high %v71_v46, %v425_v55  ;;  %170 = vst.msk [vmem:[#allocation5 + $0x8] sm:$0xf] %vm167_vm0, %v78_v47  ;;  %v96_v57 = vcombine.high %v78_v47, %v425_v55  ;;  %v97_v58 = vcombine.high %v87_v48, %v425_v55 }
  0x21   :  { %172 = vst.msk [vmem:[#allocation5 + $0x10] sm:$0xf] %vm167_vm0, %v87_v48  ;;  %174 = vst.msk [vmem:[#allocation5 + $0x18] sm:$0xf] %vm167_vm0, %v94_v49  ;;  %v98_v59 = vcombine.high %v94_v49, %v425_v55  ;;  %v163_v63 = vcombine.high %v139_v50, %v425_v55  ;;  %v164_v0 = vcombine.high %v146_v51, %v425_v55 }
  0x22   :  { %176 = vst.msk [vmem:[#allocation5 + $0x20] sm:$0xf] %vm167_vm0, %v139_v50  ;;  %178 = vst.msk [vmem:[#allocation5 + $0x28] sm:$0xf] %vm167_vm0, %v146_v51  ;;  %v201_v3 = vrot.slane %v193_v36, %v451_v8  ;;  %v217_v4 = vrot.slane %v209_v37, %v451_v8  ;;  %v165_v7 = vcombine.high %v155_v1, %v425_v55 }
  0x23   :  { %169 = vst.msk [vmem:[#allocation5 + $0x4] sm:$0xf] %vm167_vm0, %v95_v56  ;;  %171 = vst.msk [vmem:[#allocation5 + $0xc] sm:$0xf] %vm167_vm0, %v96_v57  ;;  %v166_v9 = vcombine.high %v162_v2, %v425_v55  ;;  %v261_v10 = vcombine.low %v186_v54, %v190_v61  ;;  %v277_v11 = vcombine.low %v188_v60, %v192_v62 }
  0x24   :  { %173 = vst.msk [vmem:[#allocation5 + $0x14] sm:$0xf] %vm167_vm0, %v97_v58  ;;  %175 = vst.msk [vmem:[#allocation5 + $0x1c] sm:$0xf] %vm167_vm0, %v98_v59  ;;  %v225_v12 = vcombine.low %v201_v3, %v217_v4  ;;  %v226_v13 = vcombine.high %v201_v3, %v217_v4  ;;  %v208_v14 = vrot.slane %v194_v5, %v451_v8 }
  0x25   :  { %177 = vst.msk [vmem:[#allocation5 + $0x24] sm:$0xf] %vm167_vm0, %v163_v63  ;;  %179 = vst.msk [vmem:[#allocation5 + $0x2c] sm:$0xf] %vm167_vm0, %v164_v0  ;;  %v224_v15 = vrot.slane %v210_v6, %v451_v8  ;;  %v269_v16 = vrot.slane %v261_v10, %v451_v8  ;;  %v285_v17 = vrot.slane %v277_v11, %v451_v8 }
  0x26   :  { %180 = vst.msk [vmem:[#allocation5 + $0x30] sm:$0xf] %vm167_vm0, %v155_v1  ;;  %182 = vst.msk [vmem:[#allocation5 + $0x38] sm:$0xf] %vm167_vm0, %v162_v2  ;;  %v262_v19 = vcombine.high %v186_v54, %v190_v61  ;;  %v278_v20 = vcombine.high %v188_v60, %v192_v62  ;;  %v233_v21 = vrot.slane %v225_v12, %v453_v18 }
  0x27   :  { %181 = vst.msk [vmem:[#allocation5 + $0x34] sm:$0xf] %vm167_vm0, %v165_v7  ;;  %183 = vst.msk [vmem:[#allocation5 + $0x3c] sm:$0xf] %vm167_vm0, %v166_v9  ;;  %v240_v22 = vrot.slane %v226_v13, %v453_v18  ;;  %v241_v23 = vcombine.low %v208_v14, %v224_v15  ;;  %v242_v24 = vcombine.high %v208_v14, %v224_v15 }
  0x28   :  { %v293_v25 = vcombine.low %v269_v16, %v285_v17  ;;  %v294_v26 = vcombine.high %v269_v16, %v285_v17  ;;  %v276_v27 = vrot.slane %v262_v19, %v451_v8  ;;  %v292_v28 = vrot.slane %v278_v20, %v451_v8  ;;  %330 = vst.msk [vmem:[#allocation5 + $0x40] sm:$0xf] %vm167_vm0, %v233_v21 }
  0x29   :  { %v257_v29 = vcombine.high %v233_v21, %v425_v55  ;;  %332 = vst.msk [vmem:[#allocation5 + $0x48] sm:$0xf] %vm167_vm0, %v240_v22  ;;  %v258_v30 = vcombine.high %v240_v22, %v425_v55  ;;  %v249_v31 = vrot.slane %v241_v23, %v453_v18  ;;  %v256_v32 = vrot.slane %v242_v24, %v453_v18 }
  0x2a   :  { %v301_v33 = vrot.slane %v293_v25, %v453_v18  ;;  %v308_v34 = vrot.slane %v294_v26, %v453_v18  ;;  %v309_v35 = vcombine.low %v276_v27, %v292_v28  ;;  %v310_v36 = vcombine.high %v276_v27, %v292_v28 }
  0x2b   :  { %331 = vst.msk [vmem:[#allocation5 + $0x44] sm:$0xf] %vm167_vm0, %v257_v29  ;;  %333 = vst.msk [vmem:[#allocation5 + $0x4c] sm:$0xf] %vm167_vm0, %v258_v30  ;;  %v259_v8 = vcombine.high %v249_v31, %v425_v55  ;;  %v260_v37 = vcombine.high %v256_v32, %v425_v55 }
  0x2c   :  { %334 = vst.msk [vmem:[#allocation5 + $0x50] sm:$0xf] %vm167_vm0, %v249_v31  ;;  %336 = vst.msk [vmem:[#allocation5 + $0x58] sm:$0xf] %vm167_vm0, %v256_v32  ;;  %v325_v38 = vcombine.high %v301_v33, %v425_v55  ;;  %v326_v39 = vcombine.high %v308_v34, %v425_v55  ;;  %v317_v40 = vrot.slane %v309_v35, %v453_v18 }
  0x2d   :  { %338 = vst.msk [vmem:[#allocation5 + $0x60] sm:$0xf] %vm167_vm0, %v301_v33  ;;  %340 = vst.msk [vmem:[#allocation5 + $0x68] sm:$0xf] %vm167_vm0, %v308_v34  ;;  %v324_v41 = vrot.slane %v310_v36, %v453_v18 }
  0x2e   :  { %335 = vst.msk [vmem:[#allocation5 + $0x54] sm:$0xf] %vm167_vm0, %v259_v8  ;;  %337 = vst.msk [vmem:[#allocation5 + $0x5c] sm:$0xf] %vm167_vm0, %v260_v37  ;;  %v327_v42 = vcombine.high %v317_v40, %v425_v55 }
  0x2f   :  { %339 = vst.msk [vmem:[#allocation5 + $0x64] sm:$0xf] %vm167_vm0, %v325_v38  ;;  %341 = vst.msk [vmem:[#allocation5 + $0x6c] sm:$0xf] %vm167_vm0, %v326_v39  ;;  %v328_v43 = vcombine.high %v324_v41, %v425_v55 }
  0x30   :  { %342 = vst.msk [vmem:[#allocation5 + $0x70] sm:$0xf] %vm167_vm0, %v317_v40  ;;  %344 = vst.msk [vmem:[#allocation5 + $0x78] sm:$0xf] %vm167_vm0, %v324_v41 }
  0x31   :  { %343 = vst.msk [vmem:[#allocation5 + $0x74] sm:$0xf] %vm167_vm0, %v327_v42  ;;  %345 = vst.msk [vmem:[#allocation5 + $0x7c] sm:$0xf] %vm167_vm0, %v328_v43 }
  0x32   :  { %405 = shalt.err (!%p402_p12)
}
  0x33   :  { %s406_s24 = scalar_lea.hbm %s564_s1, 2048 }
  0x34   :  { %p407_p13 = scmp.ne.s32.totalorder %s564_s1, %s406_s24  ;;  %p410_p0 = scmp.lt.u32.totalorder %s406_s24, %s564_s1 }
  0x36   :  { %p412_p1 = pnand %p410_p0, %p407_p13 }
  0x38   :  { %415 = shalt.err (!%p412_p1)
}
  0x39   :  { %s427_s29 = smov 64   ;;  %s428_s30 = smov 4  }
  0x3a   :  { %357 = dma.vmem_to_hbm [thread:$0]  %s352_s20, 2048, %s564_s1, [#allocation4], %s427_s29, %s427_s29, %s428_s30  }
  0x3b   :  { %418 = dma.done.wait [#allocation4], 2048  }
  0x3c   :  { %419 = vsyncadd [#allocation4], 4294965248 }
  0x3d   :  { %361 = vsyncpa [#allocation3], 1 }
  0x3e   :  { %362 = vsyncpa [#allocation4], 1 }

</bundles_post_ra>
